<compile_context>
chip_gen: v7x
topology: tpu7x:2x2x1
jax: 0.10.0
libtpu: 0.0.40
codegen_flags: <defaults>
</compile_context>

<pallas_src>
import jax
import jax.numpy as jnp
from jax.experimental import pallas as pl
from jax.experimental.pallas import tpu as pltpu

LANE = 128


def _round_up(n, m):
    return (n + m - 1) // m * m


def qnetwork_kernel(x_ref, w1_ref, b1_ref, w2_ref, b2_ref, w3_ref, b3_ref, o_ref):
    """One batch-tile of the 3-layer MLP.

    Matmuls run on the MXU with bf16 operands and f32 accumulation
    (preferred_element_type); bias-add and ReLU stay in f32 on the VPU.
    """
    x = x_ref[...]
    h1 = jnp.dot(x, w1_ref[...], preferred_element_type=jnp.float32) + b1_ref[...]
    h1 = jnp.maximum(h1, 0.0).astype(w2_ref.dtype)
    h2 = jnp.dot(h1, w2_ref[...], preferred_element_type=jnp.float32) + b2_ref[...]
    h2 = jnp.maximum(h2, 0.0).astype(w3_ref.dtype)
    out = jnp.dot(h2, w3_ref[...], preferred_element_type=jnp.float32) + b3_ref[...]
    o_ref[...] = out.astype(o_ref.dtype)


def init_qnetwork_params(key, state_size, action_size, h1_units=64, h2_units=64):
    """f32, unpadded params mimicking PyTorch nn.Linear default init.

    Weights stored as [in_features, out_features] (transpose of torch's [out, in])
    so the kernel computes x @ W + b. Biases kept as [1, out] for 2-D broadcast.
    """
    ks = jax.random.split(key, 6)

    def linear(kw, kb, fan_in, fan_out):
        bound = 1.0 / jnp.sqrt(jnp.float32(fan_in))
        w = jax.random.uniform(kw, (fan_in, fan_out), jnp.float32, -bound, bound)
        b = jax.random.uniform(kb, (1, fan_out), jnp.float32, -bound, bound)
        return w, b

    w1, b1 = linear(ks[0], ks[1], state_size, h1_units)
    w2, b2 = linear(ks[2], ks[3], h1_units, h2_units)
    w3, b3 = linear(ks[4], ks[5], h2_units, action_size)
    return dict(w1=w1, b1=b1, w2=w2, b2=b2, w3=w3, b3=b3)


def pack_params(params, compute_dtype=jnp.bfloat16):
    """Zero-pad hidden/output widths to 128 lanes; cast weights to the MXU dtype.

    Zero padding is exact: padded hidden units are ReLU(0 + 0) = 0 and feed zero
    weight rows into the next layer, so the math is unchanged.
    """

    def pad_to(a, rows, cols):
        r, c = a.shape
        return jnp.pad(a, ((0, rows - r), (0, cols - c)))

    s, h1 = params["w1"].shape
    h2 = params["w2"].shape[1]
    a = params["w3"].shape[1]
    h1p, h2p, ap = (_round_up(d, LANE) for d in (h1, h2, a))
    return dict(
        w1=pad_to(params["w1"], s, h1p).astype(compute_dtype),
        b1=pad_to(params["b1"], 1, h1p).astype(jnp.float32),
        w2=pad_to(params["w2"], h1p, h2p).astype(compute_dtype),
        b2=pad_to(params["b2"], 1, h2p).astype(jnp.float32),
        w3=pad_to(params["w3"], h2p, ap).astype(compute_dtype),
        b3=pad_to(params["b3"], 1, ap).astype(jnp.float32),
    )


def qnetwork_forward(x, packed, action_size, *, batch_tile=256,
                     compute_dtype=jnp.bfloat16):
    """x: [B, state_size] f32. packed: output of pack_params. Returns [B, action_size] f32."""
    w1, b1, w2, b2, w3, b3 = (packed[k] for k in ("w1", "b1", "w2", "b2", "w3", "b3"))
    B, S = x.shape
    H1p, H2p, Ap = w1.shape[1], w2.shape[1], w3.shape[1]
    assert w1.shape[0] == S

    # Small batches: one full-array block (no grid overhead). Large batches:
    # tile rows so activation DMA pipelines against compute; tile is a multiple
    # of 16 for bf16 sublane packing.
    TB = B if B <= batch_tile else batch_tile
    grid = (pl.cdiv(B, TB),)

    x = x.astype(compute_dtype)

    tile_map = lambda i: (i, 0)    # per-grid-step activation tile
    const_map = lambda i: (0, 0)   # weights/biases resident in VMEM (fetched once)

    out = pl.pallas_call(
        qnetwork_kernel,
        out_shape=jax.ShapeDtypeStruct((B, Ap), jnp.float32),
        grid=grid,
        in_specs=[
            pl.BlockSpec((TB, S), tile_map),
            pl.BlockSpec((S, H1p), const_map),
            pl.BlockSpec((1, H1p), const_map),
            pl.BlockSpec((H1p, H2p), const_map),
            pl.BlockSpec((1, H2p), const_map),
            pl.BlockSpec((H2p, Ap), const_map),
            pl.BlockSpec((1, Ap), const_map),
        ],
        out_specs=pl.BlockSpec((TB, Ap), tile_map),
        compiler_params=pltpu.CompilerParams(
            dimension_semantics=("parallel",),
        ),
    )(x, w1, b1, w2, b2, w3, b3)
    return out[:, :action_size]


def qnetwork_ref_f32(x, p):
    h1 = jnp.maximum(x @ p["w1"] + p["b1"], 0.0)
    h2 = jnp.maximum(h1 @ p["w2"] + p["b2"], 0.0)
    return h2 @ p["w3"] + p["b3"]


def qnetwork_ref_bf16(x, p):
    """Reference with the same bf16 operand casts / f32 accumulation as the kernel."""
    bf = jnp.bfloat16
    h1 = jnp.maximum(
        jnp.dot(x.astype(bf), p["w1"].astype(bf),
                preferred_element_type=jnp.float32) + p["b1"], 0.0)
    h2 = jnp.maximum(
        jnp.dot(h1.astype(bf), p["w2"].astype(bf),
                preferred_element_type=jnp.float32) + p["b2"], 0.0)
    return jnp.dot(h2.astype(bf), p["w3"].astype(bf),
                   preferred_element_type=jnp.float32) + p["b3"]


if __name__ == "__main__":
    key = jax.random.PRNGKey(0)
    k_param, k_x = jax.random.split(key)

    batch = 48
    state_size = 8
    action_size = 4
    h1_units = 64
    h2_units = 64

    params = init_qnetwork_params(k_param, state_size, action_size, h1_units, h2_units)
    packed = pack_params(params)
    x = jax.random.normal(k_x, (batch, state_size), jnp.float32)

    # Use a small batch tile here so the grid (multi-step, resident-weight) path
    # is exercised even at this small example batch.
    out = qnetwork_forward(x, packed, action_size, batch_tile=16)
    out = jax.block_until_ready(out)

    ref_bf16 = qnetwork_ref_bf16(x, params)   # same operand casts as kernel
    ref_f32 = qnetwork_ref_f32(x, params)     # exact PyTorch-semantics reference

    assert out.shape == (batch, action_size)
    assert jnp.allclose(out, ref_bf16, atol=1e-3, rtol=1e-3), "mismatch vs bf16 reference"
    assert jnp.allclose(out, ref_f32, atol=5e-2, rtol=5e-2), "mismatch vs f32 reference"

    print("KERNEL_OK")
</pallas_src>

<mosaic_0001>
module attributes {stable_mosaic.version = 11 : i64} {
  func.func @qnetwork_kernel(%arg0: i32, %arg1: memref<16x8xbf16, #tpu.memory_space<vmem>>, %arg2: memref<8x128xbf16, #tpu.memory_space<vmem>>, %arg3: memref<1x128xf32, #tpu.memory_space<vmem>>, %arg4: memref<128x128xbf16, #tpu.memory_space<vmem>>, %arg5: memref<1x128xf32, #tpu.memory_space<vmem>>, %arg6: memref<128x128xbf16, #tpu.memory_space<vmem>>, %arg7: memref<1x128xf32, #tpu.memory_space<vmem>>, %arg8: memref<16x128xf32, #tpu.memory_space<vmem>>) attributes {dimension_semantics = [#tpu.dimension_semantics<parallel>], iteration_bounds = array<i64: 3>, scalar_prefetch = 0 : i64, scratch_operands = 0 : i64, tpu.core_type = #tpu.core_type<tc>, window_params = [{transform_indices = @transform_0, window_bounds = array<i64: 16, 8>}, {pipeline_mode = #tpu.pipeline_mode<synchronous>, transform_indices = @transform_1, window_bounds = array<i64: 8, 128>}, {pipeline_mode = #tpu.pipeline_mode<synchronous>, transform_indices = @transform_2, window_bounds = array<i64: 1, 128>}, {pipeline_mode = #tpu.pipeline_mode<synchronous>, transform_indices = @transform_3, window_bounds = array<i64: 128, 128>}, {pipeline_mode = #tpu.pipeline_mode<synchronous>, transform_indices = @transform_4, window_bounds = array<i64: 1, 128>}, {pipeline_mode = #tpu.pipeline_mode<synchronous>, transform_indices = @transform_5, window_bounds = array<i64: 128, 128>}, {pipeline_mode = #tpu.pipeline_mode<synchronous>, transform_indices = @transform_6, window_bounds = array<i64: 1, 128>}, {transform_indices = @transform_7, window_bounds = array<i64: 16, 128>}]} {
    %c0 = arith.constant 0 : index
    %c0_0 = arith.constant 0 : index
    %0 = vector.load %arg1[%c0, %c0_0] : memref<16x8xbf16, #tpu.memory_space<vmem>>, vector<16x8xbf16>
    %c0_1 = arith.constant 0 : index
    %c0_2 = arith.constant 0 : index
    %1 = vector.load %arg2[%c0_1, %c0_2] : memref<8x128xbf16, #tpu.memory_space<vmem>>, vector<8x128xbf16>
    %cst = arith.constant dense<0.000000e+00> : vector<16x128xf32>
    %2 = tpu.matmul %0, %1, %cst {dimension_numbers = #tpu.dot_dimension_numbers<[1], [0], [0], [1], [0, 0, 1, 1], [], []>} : vector<16x8xbf16>, vector<8x128xbf16>, vector<16x128xf32> -> vector<16x128xf32>
    %c0_3 = arith.constant 0 : index
    %c0_4 = arith.constant 0 : index
    %3 = vector.load %arg3[%c0_3, %c0_4] : memref<1x128xf32, #tpu.memory_space<vmem>>, vector<1x128xf32>
    %4 = vector.broadcast %3 : vector<1x128xf32> to vector<16x128xf32>
    %5 = arith.addf %2, %4 : vector<16x128xf32>
    %cst_5 = arith.constant 0.000000e+00 : f32
    %6 = vector.broadcast %cst_5 : f32 to vector<16x128xf32>
    %7 = arith.maximumf %5, %6 : vector<16x128xf32>
    %8 = arith.truncf %7 : vector<16x128xf32> to vector<16x128xbf16>
    %c0_6 = arith.constant 0 : index
    %c0_7 = arith.constant 0 : index
    %9 = vector.load %arg4[%c0_6, %c0_7] : memref<128x128xbf16, #tpu.memory_space<vmem>>, vector<128x128xbf16>
    %cst_8 = arith.constant dense<0.000000e+00> : vector<16x128xf32>
    %10 = tpu.matmul %8, %9, %cst_8 {dimension_numbers = #tpu.dot_dimension_numbers<[1], [0], [0], [1], [0, 0, 1, 1], [], []>} : vector<16x128xbf16>, vector<128x128xbf16>, vector<16x128xf32> -> vector<16x128xf32>
    %c0_9 = arith.constant 0 : index
    %c0_10 = arith.constant 0 : index
    %11 = vector.load %arg5[%c0_9, %c0_10] : memref<1x128xf32, #tpu.memory_space<vmem>>, vector<1x128xf32>
    %12 = vector.broadcast %11 : vector<1x128xf32> to vector<16x128xf32>
    %13 = arith.addf %10, %12 : vector<16x128xf32>
    %cst_11 = arith.constant 0.000000e+00 : f32
    %14 = vector.broadcast %cst_11 : f32 to vector<16x128xf32>
    %15 = arith.maximumf %13, %14 : vector<16x128xf32>
    %16 = arith.truncf %15 : vector<16x128xf32> to vector<16x128xbf16>
    %c0_12 = arith.constant 0 : index
    %c0_13 = arith.constant 0 : index
    %17 = vector.load %arg6[%c0_12, %c0_13] : memref<128x128xbf16, #tpu.memory_space<vmem>>, vector<128x128xbf16>
    %cst_14 = arith.constant dense<0.000000e+00> : vector<16x128xf32>
    %18 = tpu.matmul %16, %17, %cst_14 {dimension_numbers = #tpu.dot_dimension_numbers<[1], [0], [0], [1], [0, 0, 1, 1], [], []>} : vector<16x128xbf16>, vector<128x128xbf16>, vector<16x128xf32> -> vector<16x128xf32>
    %c0_15 = arith.constant 0 : index
    %c0_16 = arith.constant 0 : index
    %19 = vector.load %arg7[%c0_15, %c0_16] : memref<1x128xf32, #tpu.memory_space<vmem>>, vector<1x128xf32>
    %20 = vector.broadcast %19 : vector<1x128xf32> to vector<16x128xf32>
    %21 = arith.addf %18, %20 : vector<16x128xf32>
    %c0_17 = arith.constant 0 : index
    %c0_18 = arith.constant 0 : index
    %22 = vector.load %arg8[%c0_17, %c0_18] : memref<16x128xf32, #tpu.memory_space<vmem>>, vector<16x128xf32>
    tpu.vector_store %arg8[%c0_17, %c0_18], %21 {strides = array<i32>} : memref<16x128xf32, #tpu.memory_space<vmem>>, vector<16x128xf32>,
    return
  }
  func.func @transform_0(%arg0: i32) -> (i32, i32) {
    %c0_i32 = arith.constant 0 : i32
    %c0_i32_0 = arith.constant 0 : i32
    return %arg0, %c0_i32 : i32, i32
  }
  func.func @transform_1(%arg0: i32) -> (i32, i32) {
    %c0_i32 = arith.constant 0 : i32
    %c0_i32_0 = arith.constant 0 : i32
    %c0_i32_1 = arith.constant 0 : i32
    return %c0_i32, %c0_i32_0 : i32, i32
  }
  func.func @transform_2(%arg0: i32) -> (i32, i32) {
    %c0_i32 = arith.constant 0 : i32
    %c0_i32_0 = arith.constant 0 : i32
    %c0_i32_1 = arith.constant 0 : i32
    return %c0_i32, %c0_i32_0 : i32, i32
  }
  func.func @transform_3(%arg0: i32) -> (i32, i32) {
    %c0_i32 = arith.constant 0 : i32
    %c0_i32_0 = arith.constant 0 : i32
    %c0_i32_1 = arith.constant 0 : i32
    return %c0_i32, %c0_i32_0 : i32, i32
  }
  func.func @transform_4(%arg0: i32) -> (i32, i32) {
    %c0_i32 = arith.constant 0 : i32
    %c0_i32_0 = arith.constant 0 : i32
    %c0_i32_1 = arith.constant 0 : i32
    return %c0_i32, %c0_i32_0 : i32, i32
  }
  func.func @transform_5(%arg0: i32) -> (i32, i32) {
    %c0_i32 = arith.constant 0 : i32
    %c0_i32_0 = arith.constant 0 : i32
    %c0_i32_1 = arith.constant 0 : i32
    return %c0_i32, %c0_i32_0 : i32, i32
  }
  func.func @transform_6(%arg0: i32) -> (i32, i32) {
    %c0_i32 = arith.constant 0 : i32
    %c0_i32_0 = arith.constant 0 : i32
    %c0_i32_1 = arith.constant 0 : i32
    return %c0_i32, %c0_i32_0 : i32, i32
  }
  func.func @transform_7(%arg0: i32) -> (i32, i32) {
    %c0_i32 = arith.constant 0 : i32
    %c0_i32_0 = arith.constant 0 : i32
    return %arg0, %c0_i32 : i32, i32
  }
}

</mosaic_0001>

<bundles_post_ra>
// kernel: tpu_custom_call.1
= control target key start
LH: loop header
LB: loop body
LE: loop exit
PB: predicated region body
PF: predicated region fallthrough
CT: control target
= control target key end

     0   :  { %12 = vsyncpa [#allocation3], 0  ;;  %s1278_s0 = inlined_call_operand.vmem [shape: bf16[48,8], index: 0, kind: input, shape index: {}]   ;;  %s1279_s1 = inlined_call_operand.vmem [shape: bf16[8,128], index: 1, kind: input, shape index: {}]   ;;  %s1280_s2 = inlined_call_operand.vmem [shape: f32[1,128], index: 2, kind: input, shape index: {}]   ;;  %s1281_s3 = inlined_call_operand.hbm [shape: bf16[128,128], index: 3, kind: input, shape index: {}]   ;;  %s1282_s4 = inlined_call_operand.vmem [shape: f32[1,128], index: 4, kind: input, shape index: {}]   ;;  %s1283_s5 = inlined_call_operand.hbm [shape: bf16[128,128], index: 5, kind: input, shape index: {}]   ;;  %s1284_s6 = inlined_call_operand.vmem [shape: f32[1,128], index: 6, kind: input, shape index: {}]   ;;  %s1285_s7 = inlined_call_operand.hbm [shape: f32[48,128], index: 7, kind: output, shape index: {}]  }
   0x1   :  { %13 = vsyncpa [#allocation6], 0 }
   0x2   :  { %14 = vsyncpa [#allocation4], 0 }
   0x3   :  { %16 = vsyncpa [#allocation4 + $0x1], 0  ;;  %s1069_s24 = smov 0   ;;  %s1071_s25 = smov 0  }
   0x4   :  { %s1073_s26 = smov 0   ;;  %s1075_s27 = smov 0  }
   0x5 LB: > { %s1090_s28 = sadd.s32 4294967295, %s1018_s27   ;;  %s705_s29 = sadd.s32 4294967294, %s1018_s27   ;;  %s1018_s27 = sphi %s1075_s27, %s1305_s27   ;;  %s1014_s26 = sphi %s1073_s26, %s1304_s26   ;;  %s1010_s25 = sphi %s1071_s25, %s1303_s25   ;;  %s1006_s24 = sphi %s1069_s24, %s1302_s24  }
   0x6   : > { %s1094_s30 = sadd.s32 1, %s1018_s27   ;;  %s181_s8 = sadd.s32 1, %s1014_s26 }
   0x7   : > { %s178_s9 = ssub.s32 %s1018_s27, %s1094_s30  ;;  %p191_p0 = scmp.ne.s32.totalorder %s1014_s26, %s1010_s25 }
   0x8   : > { %p179_p1 = scmp.eq.s32.totalorder %s178_s9, 0  ;;  %p192_p2 = scmp.eq.s32.totalorder %s1090_s28, 2 }
   0x9   : > { %p197_p3 = scmp.ne.s32.totalorder %s1010_s25, %s1006_s24  ;;  %p198_p4 = scmp.eq.s32.totalorder %s705_s29, 2 }
   0xa   : > { %s1105_s10 = scalar_select %p179_p1, %s1014_s26, %s181_s8  }
   0xb   : > { %p1107_p5 = por %p192_p2, %p191_p0  ;;  %p1111_p6 = por %p198_p4, %p197_p3 }
   0xc   : > { %1289 = sst [smem:[#allocation11_spill]] %s1105_s10  ;;  %p706_p7 = scmp.ge.s32.totalorder %s1018_s27, 1 }
   0xd   : > { %s1290_s11 = scalar_select %p1107_p5, 1, 0 }
   0xe   : > { %s1291_s12 = scalar_select %p1111_p6, 1, 0 }
   0xf   : > { %p205_p8 = scmp.lt.s32.totalorder %s1018_s27, 4  ;;  %p1286_p9 = scmp.eq.s32.totalorder %s1090_s28, 0 }
  0x10   : > { %s1020_s14 = smov [#allocation2]   ;;  %s1021_s17 = smov [#allocation5]  }
  0x11   : > { %p1118_p10 = pnand %p706_p7, %p205_p8  ;;  %s223_s15 = sshll.u32 %s1020_s14, 4  ;;  %s224_s15 = int_to_ptr.vmem [resolvable:$true] %s223_s15 }
  0x12   : > { %s239_s18 = sshll.u32 %s1021_s17, 4  ;;  %s892_s21 = scalar_lea.hbm %s1281_s3, 1024  ;;  %s1130_s18 = int_to_ptr.vmem [resolvable:$true] %s239_s18 }
  0x13   : > { %s1292_s13 = scalar_select %p1118_p10, 1, 0 }
  0x14   : > { %p819_p11 = pneg %p1118_p10  ;;  %p893_p13 = scmp.ne.s32.totalorder %s1281_s3, %s892_s21 }
  0x15   : > { %p899_p3 = scmp.lt.u32.totalorder %s892_s21, %s1281_s3 }
  0x16   : > { %p1126_p12 = pnand %p1286_p9, %p819_p11 }
  0x18   : > { %p894_p0 = pneg %p1126_p12 }
  0x1a   : > { %p895_p1 = pnand %p894_p0, %p893_p13 }
  0x1c   : > { %p896_p2 = pneg %p895_p1 }
  0x1e   : > { %p901_p4 = pnand %p899_p3, %p896_p2 }
  0x20   : > { %904 = shalt.err (!%p901_p4)
}
  0x21   : > { %s905_s9 = scalar_lea.vmem %s224_s15, 1024  ;;  %p913_p9 = scmp.lt.s32.totalorder %s224_s15, %s224_s15 }
  0x22   : > { %p906_p7 = scmp.ne.s32.totalorder %s224_s15, %s905_s9  ;;  %p914_p6 = scmp.lt.s32.totalorder %s905_s9, %s905_s9 }
  0x24   : > { %p908_p8 = pnand %p906_p7, %p894_p0  ;;  %p915_p5 = por %p914_p6, %p913_p9 }
  0x26   : > { %p909_p11 = pneg %p908_p8 }
  0x28   : > { %p916_p10 = pnand %p915_p5, %p909_p11 }
  0x2a   : > { %919 = shalt.err (!%p916_p10)
}
  0x2b   : > { %s1022_s14 = smov 64   ;;  %s1023_s17 = smov 4  }
  0x2c   : > { %822 = dma.hbm_to_vmem [thread:$0]  (!%p1126_p12), %s1281_s3, 1024, %s224_s15, [#allocation3], %s1022_s14, %s1022_s14, %s1023_s17  }
  0x2d   : > { %s920_s23 = scalar_lea.hbm %s1283_s5, 1024 }
  0x2e   : > { %p921_p13 = scmp.ne.s32.totalorder %s1283_s5, %s920_s23  ;;  %p927_p9 = scmp.lt.u32.totalorder %s920_s23, %s1283_s5 }
  0x30   : > { %p923_p5 = pnand %p921_p13, %p894_p0 }
  0x32   : > { %p924_p6 = pneg %p923_p5 }
  0x34   : > { %p929_p10 = pnand %p927_p9, %p924_p6 }
  0x36   : > { %932 = shalt.err (!%p929_p10)
}
  0x37   : > { %s933_s15 = scalar_lea.vmem %s1130_s18, 1024  ;;  %p941_p4 = scmp.lt.s32.totalorder %s1130_s18, %s1130_s18 }
  0x38   : > { %p934_p1 = scmp.ne.s32.totalorder %s1130_s18, %s933_s15  ;;  %p942_p7 = scmp.lt.s32.totalorder %s933_s15, %s933_s15 }
  0x3a   : > { %p936_p2 = pnand %p934_p1, %p894_p0  ;;  %p943_p8 = por %p942_p7, %p941_p4 }
  0x3c   : > { %p937_p3 = pneg %p936_p2 }
  0x3e   : > { %p944_p11 = pnand %p943_p8, %p937_p3 }
  0x40   : > { %947 = shalt.err (!%p944_p11)
}
  0x41   : > { %825 = dma.hbm_to_vmem [thread:$0]  (!%p1126_p12), %s1283_s5, 1024, %s1130_s18, [#allocation6], %s1022_s14, %s1022_s14, %s1023_s17  }
  0x42   : > { %p1294_p13 = scmp.ne.s32.totalorder %s1292_s13, 0 }
  0x43   : > { %p1295_p5 = scmp.eq.s32.totalorder (!%p1294_p13), %s1090_s28, 0 }
  0x44   : > { %267 = sbr.rel (%p1294_p13) target bundleno = 758 (0x2f6), region = 48 }
  0x4b   : > { %993 = dma.done.wait (%p1295_p5), [#allocation3], 1024   ;;  %p1296_p0 = pmov %p1295_p5 }
  0x4d   : > { %995 = vsyncadd (%p1296_p0), [#allocation3], 4294966272  ;;  %p1297_p6 = pmov %p1296_p0 }
  0x4e   : > { %p1298_p9 = pmov %p1296_p0 }
  0x4f   : > { %997 = dma.done.wait (%p1297_p6), [#allocation6], 1024  }
  0x50   : > { %999 = vsyncadd (%p1298_p9), [#allocation6], 4294966272  ;;  %s714_s16 = sshll.u32 %s1090_s28, 1  ;;  %v1024_v0 = vmov 0.0   ;;  %vm1025_vm0 = vmmov 0   ;;  %vm330_vm1 = vcmask 1043456  }
  0x51   : > { %763 = vmatprep.subr.bf16.mxu0 %v1024_v0  ;;  %765 = vmatprep.mubr.msk.bf16.mxu0 %vm1025_vm0, %v1024_v0  ;;  %p304_p12 = scmp.lt.s32.totalorder %s714_s16, 5  ;;  %v313_v1 = vld [vmem:[%s1279_s1] sm:$0xf]  ;;  %vm326_vm2 = vcmask 64512   ;;  %v877_v5 = vld [vmem:[#allocation2 + $0x8] sm:$0xff]   ;;  %v878_v6 = vld [vmem:[#allocation2 + $0x10] sm:$0xff]  }
  0x52   : > { %769 = vmatprep.subr.bf16.mxu1 %v1024_v0  ;;  %785 = vmatprep.mubr.msk.bf16.mxu1 %vm1025_vm0, %v1024_v0  ;;  %v332_v2 = vsel %vm330_vm1, %v313_v1, 0  ;;  %v876_v4 = vld [vmem:[#allocation2] sm:$0xff]   ;;  %v879_v7 = vld [vmem:[#allocation2 + $0x18] sm:$0xff]   ;;  %v881_v9 = vld [vmem:[#allocation2 + $0x28] sm:$0xff]   ;;  %s300_s9 = sand.u32 1, %s1010_s25   ;;  %s742_s18 = sshll.u32 %s1090_s28, 8 }
  0x53   : > { %s1307_s16 = smov (!%p304_p12, %s714_s16), 5  ;;  %764 = vmatpush3.bf16.msra.mxu0 %v332_v2  ;;  %770 = vmatpush3.bf16.msra.mxu1 %v876_v4  ;;  %v880_v8 = vld [vmem:[#allocation2 + $0x20] sm:$0xff]   ;;  %v882_v10 = vld [vmem:[#allocation2 + $0x30] sm:$0xff]   ;;  %v883_v11 = vld [vmem:[#allocation2 + $0x38] sm:$0xff]   ;;  %s713_s15 = sshll.u32 %s300_s9, 4 }
  0x54   : > { %s715_s13 = sshll.u32 %s1307_s16, 2  ;;  %789 = vmatprep.subr.bf16.mxu0 %v1024_v0  ;;  %771 = vmatprep.subr.bf16.mxu1 %v1024_v0  ;;  %v884_v12 = vld [vmem:[#allocation5] sm:$0xff]   ;;  %v885_v13 = vld [vmem:[#allocation5 + $0x8] sm:$0xff]   ;;  %v886_v14 = vld [vmem:[#allocation5 + $0x10] sm:$0xff]   ;;  %s302_s16 = scalar_lea.vmem [#allocation7], %s713_s15 }
  0x55   : > { %s307_s17 = scalar_lea.vmem %s1278_s0, %s715_s13  ;;  %v887_v15 = vld [vmem:[#allocation5 + $0x18] sm:$0xff]   ;;  %v888_v16 = vld [vmem:[#allocation5 + $0x20] sm:$0xff]   ;;  %v889_v17 = vld [vmem:[#allocation5 + $0x28] sm:$0xff]   ;;  %s621_s13 = sshll.u32 %s302_s16, 4  ;;  %s1230_s13 = int_to_ptr.vmem [resolvable:$true] %s621_s13 }
  0x56   : > { %v875_v3 = vld [vmem:[%s307_s17] sm:$0xff]   ;;  %v890_v28 = vld [vmem:[#allocation5 + $0x30] sm:$0xff]   ;;  %v891_v29 = vld [vmem:[#allocation5 + $0x38] sm:$0xff]   ;;  %s1235_s20 = scalar_lea.hbm %s1285_s7, %s742_s18  ;;  %s1237_s21 = scalar_lea.sflag [#allocation4], %s300_s9 }
  0x57   : > { %766 = vmatmul.mubr.msk.bf16.vlgmr.msra.gmra.mrb[0].mxu0 %vm326_vm2, %v875_v3  ;;  %772 = vmatpush3.bf16.msra.mxu1 %v877_v5  ;;  %v716_v18 = vld [vmem:[%s1280_s2] ss:$0 sm:$0xff]  ;;  %s948_s28 = scalar_lea.vmem %s1230_s13, 256  ;;  %p1299_p1 = scmp.ne.s32.totalorder %s1290_s11, 0 }
  0x58   : > { %805 = vmatprep.mubr.msk.bf16.mxu0 %vm1025_vm0, %v1024_v0  ;;  %773 = vmatprep.subr.bf16.mxu1 %v1024_v0  ;;  %v719_v30 = vld [vmem:[%s1282_s4] ss:$0 sm:$0xff]  ;;  %p949_p10 = scmp.ne.s32.totalorder %s1230_s13, %s948_s28  ;;  %s1026_s22 = smov [#allocation7]  }
  0x59   : > { %790 = vmatpush3.bf16.msra.mxu0 %v884_v12  ;;  %v728_v40 = vld [vmem:[%s1284_s6] ss:$0 sm:$0xff]  ;;  %s952_s23 = sshll.u32 %s1026_s22, 4  ;;  %s953_s23 = int_to_ptr.vmem [resolvable:$false] %s952_s23 }
  0x5a   : > { %791 = vmatprep.subr.bf16.mxu0 %v1024_v0  ;;  %p950_p2 = pnand %p949_p10, %p1299_p1  ;;  %s954_s29 = scalar_lea.vmem %s953_s23, 512 }
  0x5b   : > { %774 = vmatpush3.bf16.msra.mxu1 %v878_v6  ;;  %p955_p4 = scmp.lt.s32.totalorder %s1230_s13, %s953_s23  ;;  %p956_p7 = scmp.lt.s32.totalorder %s954_s29, %s948_s28 }
  0x5c   : > { %775 = vmatprep.subr.bf16.mxu1 %v1024_v0  ;;  %p951_p3 = pneg %p950_p2 }
  0x5d   : > { %792 = vmatpush3.bf16.msra.mxu0 %v885_v13  ;;  %p957_p8 = por %p956_p7, %p955_p4 }
  0x5e   : > { %793 = vmatprep.subr.bf16.mxu0 %v1024_v0 }
  0x5f   : > { %776 = vmatpush3.bf16.msra.mxu1 %v879_v7  ;;  %p958_p11 = pnand %p957_p8, %p951_p3 }
  0x60   : > { %777 = vmatprep.subr.bf16.mxu1 %v1024_v0 }
  0x61   : > { %794 = vmatpush3.bf16.msra.mxu0 %v886_v14 }
  0x62   : > { %795 = vmatprep.subr.bf16.mxu0 %v1024_v0 }
  0x63   : > { %778 = vmatpush3.bf16.msra.mxu1 %v880_v8 }
  0x64   : > { %779 = vmatprep.subr.bf16.mxu1 %v1024_v0 }
  0x65   : > { %796 = vmatpush3.bf16.msra.mxu0 %v887_v15 }
  0x66   : > { %797 = vmatprep.subr.bf16.mxu0 %v1024_v0 }
  0x67   : > { %780 = vmatpush3.bf16.msra.mxu1 %v881_v9 }
  0x68   : > { %781 = vmatprep.subr.bf16.mxu1 %v1024_v0 }
  0x69   : > { %798 = vmatpush3.bf16.msra.mxu0 %v888_v16 }
  0x6a   : > { %799 = vmatprep.subr.bf16.mxu0 %v1024_v0 }
  0x6b   : > { %782 = vmatpush3.bf16.msra.mxu1 %v882_v10 }
  0x6c   : > { %783 = vmatprep.subr.bf16.mxu1 %v1024_v0 }
  0x6d   : > { %800 = vmatpush3.bf16.msra.mxu0 %v889_v17 }
  0x6e   : > { %801 = vmatprep.subr.bf16.mxu0 %v1024_v0 }
  0x6f   : > { %784 = vmatpush3.bf16.msra.mxu1 %v883_v11 }
  0x71   : > { %802 = vmatpush3.bf16.msra.mxu0 %v890_v28 }
  0x72   : > { %803 = vmatprep.subr.bf16.mxu0 %v1024_v0 }
  0x75   : > { %804 = vmatpush3.bf16.msra.mxu0 %v891_v29 }
 0x12a   : > { %v368_v19 = vpop.f32.mrb[0].mxu0 }
 0x12b   : > { %v369_v20 = vadd.f32 %v716_v18, %v368_v19  ;;  %v767_v21 = vpop.f32.mrb[1].mxu0 }
 0x12c   : > { %v371_v22 = vpop.f32.mrb[2].mxu0 }
 0x12d   : > { %v372_v23 = vadd.f32 %v716_v18, %v371_v22  ;;  %v768_v24 = vpop.f32.mrb[3].mxu0  ;;  %v375_v25 = vmax.f32 %v369_v20, 0.0 }
 0x12f   : > { %v376_v26 = vmax.f32 %v372_v23, 0.0 }
 0x131   : > { %v377_v27 = vpack.c.bf16 %v376_v26, %v375_v25 }
 0x133   : > { %786 = vmatmul.mubr.bf16.vlgmr.msra.gmra.mrb[0].mxu1 %v377_v27 }
 0x206   : > { %v483_v31 = vpop.f32.mrb[0].mxu1 }
 0x207   : > { %v484_v32 = vadd.f32 %v719_v30, %v483_v31  ;;  %v787_v33 = vpop.f32.mrb[1].mxu1 }
 0x208   : > { %v486_v34 = vpop.f32.mrb[2].mxu1 }
 0x209   : > { %v487_v35 = vadd.f32 %v719_v30, %v486_v34  ;;  %v788_v36 = vpop.f32.mrb[3].mxu1  ;;  %v490_v37 = vmax.f32 %v484_v32, 0.0 }
 0x20b   : > { %v491_v38 = vmax.f32 %v487_v35, 0.0 }
 0x20d   : > { %v492_v39 = vpack.c.bf16 %v491_v38, %v490_v37 }
 0x20f   : > { %806 = vmatmul.mubr.bf16.vlgmr.msra.gmra.mrb[4].mxu0 %v492_v39 }
 0x2e2   : > { %v598_v41 = vpop.f32.mrb[4].mxu0 }
 0x2e3   : > { %v599_v42 = vadd.f32 %v728_v40, %v598_v41  ;;  %v807_v43 = vpop.f32.mrb[5].mxu0 }
 0x2e4   : > { %v601_v44 = vpop.f32.mrb[6].mxu0 }
 0x2e5   : > { %605 = vst [vmem:[%s302_s16] sm:$0xff] %v599_v42  ;;  %v602_v45 = vadd.f32 %v728_v40, %v601_v44  ;;  %v808_v46 = vpop.f32.mrb[7].mxu0 }
 0x2e7   : > { %606 = vst [vmem:[%s302_s16 + $0x8] sm:$0xff] %v602_v45 }
 0x2e8   : > { %961 = shalt.err (!%p958_p11)
}
 0x2e9   : > { %s962_s8 = scalar_lea.hbm %s1235_s20, 256  ;;  %s966_s10 = scalar_lea.hbm %s1285_s7, 768 }
 0x2ea   : > { %p963_p13 = scmp.ne.s32.totalorder %s1235_s20, %s962_s8  ;;  %p967_p6 = scmp.lt.u32.totalorder %s1235_s20, %s1285_s7 }
 0x2eb   : > { %p968_p9 = scmp.lt.u32.totalorder %s966_s10, %s962_s8  ;;  %p970_p10 = scmp.lt.u32.totalorder %s962_s8, %s1235_s20 }
 0x2ec   : > { %p964_p5 = pnand %p963_p13, %p1299_p1 }
 0x2ed   : > { %p969_p12 = por %p968_p9, %p967_p6 }
 0x2ee   : > { %p965_p0 = pneg %p964_p5 }
 0x2ef   : > { %p971_p2 = por %p970_p10, %p969_p12 }
 0x2f1   : > { %p972_p3 = pnand %p971_p2, %p965_p0 }
 0x2f3   : > { %975 = shalt.err (!%p972_p3)
}
 0x2f4   : > { %s1027_s18 = smov 128   ;;  %s1028_s14 = smov 8  }
 0x2f5   : > { %817 = dma.vmem_to_hbm [thread:$0]  (%p1299_p1), %s1230_s13, 256, %s1235_s20, %s1237_s21, %s1027_s18, %s1027_s18, %s1028_s14  }
 0x2f6 PF: > { %p834_p4 = scmp.ge.s32.totalorder %s1018_s27, 2  ;;  %s636_s17 = sand.u32 1, %s1006_s24  }
 0x2f7   : > { %p1300_p7 = scmp.ne.s32.totalorder %s1291_s12, 0  ;;  %s637_s28 = scalar_lea.sflag [#allocation4], %s636_s17 }
 0x2f9   : > { %p827_p8 = pnand %p834_p4, %p1300_p7 }
 0x2fb   : > { %1001 = dma.done.wait (!%p827_p8), %s637_s28, 256  }
 0x2fc   : > { %1003 = vsyncadd (!%p827_p8), %s637_s28, 4294967040  ;;  %s1301_s22 = sld [smem:[#allocation11_spill]]  ;;  %p19_p11 = scmp.ge.s32.totalorder %s1094_s30, 5  }
 0x2fd   : > { %s1302_s24 = smov %s1010_s25  ;;  %s1303_s25 = smov %s1014_s26 }
 0x2fe   : > { %s1305_s27 = smov %s1094_s30  ;;  %21 = sbr.rel (!%p19_p11) target bundleno = 5 (0x5), region = 92 }
 0x302   : > { %s1304_s26 = smov %s1301_s22 }
 0x305   :  { %642 = vsyncpa [#allocation3], 1 }
 0x306   :  { %644 = vsyncpa [#allocation3 + $0x1], 1 }
 0x307   :  { %645 = vsyncpa [#allocation6], 1 }
 0x308   :  { %646 = vsyncpa [#allocation4], 1 }
 0x309   :  { %648 = vsyncpa [#allocation4 + $0x1], 1 }

</bundles_post_ra>
